<compile_context>
chip_gen: v7x
topology: tpu7x:2x2x1
jax: 0.10.0
libtpu: 0.0.40
codegen_flags: <defaults>
</compile_context>

<pallas_src>
import functools
import math

import jax
import jax.numpy as jnp
from jax import lax
from jax.experimental import pallas as pl
from jax.experimental.pallas import tpu as pltpu

_VMEM_LIMIT = 32 * 1024 * 1024   # scoped-VMEM request valid on v5e/v6e/v7x
_NEG_INF = -1e9                  # same fill value as the PyTorch masked_fill


def _pick_tile(dim, target, align):
    """Largest tile <= target that divides `dim` and is a multiple of `align`,
    falling back to the full dimension (always a legal BlockSpec block)."""
    if dim <= target:
        return dim
    t = (target // align) * align
    while t >= align:
        if dim % t == 0:
            return t
        t -= align
    return dim


def _heads_per_block(num_heads, depth):
    """Smallest head group whose width (hb*depth) is lane-aligned (128) so a
    head group can be sliced out of the packed (B, S, H*depth) layout by the
    BlockSpec.  For small models this falls back to all heads (width == D)."""
    for hb in range(1, num_heads + 1):
        if num_heads % hb == 0 and (hb * depth) % 128 == 0:
            return hb
    return num_heads


# ----------------------------------------------------------------------------
# Tiled dense projection: y = x @ W + b
# ----------------------------------------------------------------------------
def _dense_kernel(x_ref, w_ref, b_ref, o_ref):
    x = x_ref[...].astype(jnp.bfloat16)
    w = w_ref[...].astype(jnp.bfloat16)
    y = jnp.dot(x, w, preferred_element_type=jnp.float32) + b_ref[...]
    o_ref[...] = y.astype(o_ref.dtype)


def dense(x2d, w_t, b, out_dtype=jnp.float32):
    """x2d: (N, Din), w_t: (Din, Dout) pre-transposed, b: (1, Dout)."""
    n, din = x2d.shape
    dout = w_t.shape[1]
    tm = _pick_tile(n, 256, 8)        # row tile (sublane-aligned)
    tn = _pick_tile(dout, 256, 128)   # col tile (lane-aligned -> dense vst)
    # NOTE: Din (contraction) is kept whole per block; tile it with a third
    # "arbitrary" grid axis + f32 accumulator scratch for very large d_model.
    return pl.pallas_call(
        _dense_kernel,
        out_shape=jax.ShapeDtypeStruct((n, dout), out_dtype),
        grid=(n // tm, dout // tn),
        in_specs=[
            pl.BlockSpec((tm, din), lambda i, j: (i, 0)),
            pl.BlockSpec((din, tn), lambda i, j: (0, j)),
            pl.BlockSpec((1, tn), lambda i, j: (0, j)),
        ],
        out_specs=pl.BlockSpec((tm, tn), lambda i, j: (i, j)),
        compiler_params=pltpu.CompilerParams(
            dimension_semantics=("parallel", "parallel"),
            vmem_limit_bytes=_VMEM_LIMIT,
        ),
    )(x2d, w_t, b)


# ----------------------------------------------------------------------------
# Flash-style multi-head attention, packed (B, S, H*depth) layout in and out
# ----------------------------------------------------------------------------
def _flash_kernel(q_ref, k_ref, v_ref, bias_ref, o_ref,
                  m_sc, l_sc, acc_sc, *, heads_per_block, depth, scale):
    kv_i = pl.program_id(3)

    @pl.when(kv_i == 0)
    def _init():
        m_sc[...] = jnp.full_like(m_sc, -jnp.inf)
        l_sc[...] = jnp.zeros_like(l_sc)
        acc_sc[...] = jnp.zeros_like(acc_sc)

    bias = bias_ref[...].astype(jnp.float32)          # (tq, tk), shared by heads

    for h in range(heads_per_block):                  # static, unrolled
        lo, hi = h * depth, (h + 1) * depth
        # fold 1/sqrt(d_k) into q (O(tq*d)) instead of dividing (tq,tk) scores
        q = (q_ref[:, lo:hi].astype(jnp.float32) * scale).astype(jnp.bfloat16)
        k = k_ref[:, lo:hi]
        # contract the last dim of both operands: no k.T / relayout
        s = lax.dot_general(q, k, (((1,), (1,)), ((), ())),
                            preferred_element_type=jnp.float32)
        s = s + bias                                  # additive mask bias

        m_prev = m_sc[h]
        m_new = jnp.maximum(m_prev, jnp.max(s, axis=-1, keepdims=True))
        alpha = jnp.exp(m_prev - m_new)
        p = jnp.exp(s - m_new)
        l_sc[h] = alpha * l_sc[h] + jnp.sum(p, axis=-1, keepdims=True)
        acc_sc[h] = alpha * acc_sc[h] + jnp.dot(
            p.astype(jnp.bfloat16), v_ref[:, lo:hi],
            preferred_element_type=jnp.float32)
        m_sc[h] = m_new

    @pl.when(kv_i == pl.num_programs(3) - 1)
    def _finalize():
        for h in range(heads_per_block):
            o_ref[:, h * depth:(h + 1) * depth] = (
                acc_sc[h] * pl.reciprocal(l_sc[h], approx=True)
            ).astype(o_ref.dtype)


def flash_mha(q_p, k_p, v_p, mask_bias, num_heads, depth):
    """q_p/k_p/v_p: (B, S, H*depth) bf16 projections; mask_bias: (B, Sq, Sk)."""
    B, Sq, D = q_p.shape
    Sk = k_p.shape[1]
    hb = _heads_per_block(num_heads, depth)
    gw = hb * depth                                   # head-group (lane) width
    tq = _pick_tile(Sq, 128, 8)
    tk = _pick_tile(Sk, 128, 128)
    grid = (B, num_heads // hb, Sq // tq, Sk // tk)

    kernel = functools.partial(_flash_kernel, heads_per_block=hb,
                               depth=depth, scale=1.0 / math.sqrt(depth))
    return pl.pallas_call(
        kernel,
        out_shape=jax.ShapeDtypeStruct((B, Sq, D), jnp.bfloat16),
        grid=grid,
        in_specs=[
            pl.BlockSpec((None, tq, gw), lambda b, g, qi, ki: (b, qi, g)),
            pl.BlockSpec((None, tk, gw), lambda b, g, qi, ki: (b, ki, g)),
            pl.BlockSpec((None, tk, gw), lambda b, g, qi, ki: (b, ki, g)),
            pl.BlockSpec((None, tq, tk), lambda b, g, qi, ki: (b, qi, ki)),
        ],
        out_specs=pl.BlockSpec((None, tq, gw), lambda b, g, qi, ki: (b, qi, g)),
        scratch_shapes=[
            pltpu.VMEM((hb, tq, 1), jnp.float32),      # running max
            pltpu.VMEM((hb, tq, 1), jnp.float32),      # running denom
            pltpu.VMEM((hb, tq, depth), jnp.float32),  # running weighted sum
        ],
        compiler_params=pltpu.CompilerParams(
            dimension_semantics=("parallel", "parallel", "parallel", "arbitrary"),
            vmem_limit_bytes=_VMEM_LIMIT,
        ),
    )(q_p, k_p, v_p, mask_bias)


# ----------------------------------------------------------------------------
# Module wrapper (matches the PyTorch MultiHeadAttention forward)
# ----------------------------------------------------------------------------
class MultiHeadAttentionPallas:
    def __init__(self, d_model, num_heads, key):
        self.num_heads = num_heads
        self.depth = d_model // num_heads
        self.d_model = self.num_heads * self.depth

        keys = jax.random.split(key, 8)
        bound = 1.0 / math.sqrt(d_model)

        def u(k, shape):
            return jax.random.uniform(k, shape, jnp.float32, -bound, bound)

        # Weights stored pre-transposed (Din, Dout); biases stored as (1, Dout).
        self.wq_wt, self.wq_b = u(keys[0], (d_model, d_model)), u(keys[1], (1, d_model))
        self.wk_wt, self.wk_b = u(keys[2], (d_model, d_model)), u(keys[3], (1, d_model))
        self.wv_wt, self.wv_b = u(keys[4], (d_model, d_model)), u(keys[5], (1, d_model))
        self.wo_wt, self.wo_b = u(keys[6], (d_model, d_model)), u(keys[7], (1, d_model))

    def __call__(self, q, k, v, mask):
        B, Sq, D = q.shape
        Sk = k.shape[1]

        # Q/K/V projections (bf16 outputs -> half the HBM traffic into attention).
        # NOTE(synk): fusing Q/K/V into one matmul only applies to self-attention;
        # this module's signature takes distinct q, k, v tensors.
        q_p = dense(q.reshape(B * Sq, D), self.wq_wt, self.wq_b, jnp.bfloat16)
        k_p = dense(k.reshape(B * Sk, D), self.wk_wt, self.wk_b, jnp.bfloat16)
        v_p = dense(v.reshape(B * Sk, D), self.wv_wt, self.wv_b, jnp.bfloat16)

        # masked_fill(mask == 0, -1e9) -> additive bias (identical result unless a
        # row is fully masked, in which case both produce meaningless attention).
        if mask is None:
            bias = jnp.zeros((B, Sq, Sk), jnp.bfloat16)
        else:
            bias = jnp.where(mask == 0, jnp.float32(_NEG_INF),
                             jnp.float32(0.0)).astype(jnp.bfloat16)

        ctx = flash_mha(q_p.reshape(B, Sq, D), k_p.reshape(B, Sk, D),
                        v_p.reshape(B, Sk, D), bias, self.num_heads, self.depth)

        out = dense(ctx.reshape(B * Sq, D), self.wo_wt, self.wo_b, jnp.float32)
        return out.reshape(B, Sq, self.d_model)


# ----------------------------------------------------------------------------
# Pure-JAX (f32) reference mirroring the PyTorch forward
# ----------------------------------------------------------------------------
def reference_forward(mha, q, k, v, mask):
    B, Sq, D = q.shape
    qp = q @ mha.wq_wt + mha.wq_b
    kp = k @ mha.wk_wt + mha.wk_b
    vp = v @ mha.wv_wt + mha.wv_b

    def split(t):
        return jnp.transpose(
            t.reshape(B, -1, mha.num_heads, mha.depth), (0, 2, 1, 3))

    qh, kh, vh = split(qp), split(kp), split(vp)
    scores = jnp.einsum("bhqd,bhkd->bhqk", qh, kh) / math.sqrt(mha.depth)
    if mask is not None:
        scores = jnp.where(mask[:, None, :, :] == 0, _NEG_INF, scores)
    attn = jax.nn.softmax(scores, axis=-1)
    ctx = jnp.einsum("bhqk,bhkd->bhqd", attn, vh)
    ctx = jnp.transpose(ctx, (0, 2, 1, 3)).reshape(B, Sq, D)
    return ctx @ mha.wo_wt + mha.wo_b


# ----------------------------------------------------------------------------
if __name__ == "__main__":
    batch, seq, d_model, num_heads = 2, 8, 32, 4

    key = jax.random.PRNGKey(0)
    k_params, k_q, k_k, k_v = jax.random.split(key, 4)

    mha = MultiHeadAttentionPallas(d_model, num_heads, k_params)

    q = jax.random.normal(k_q, (batch, seq, d_model), jnp.float32)
    k = jax.random.normal(k_k, (batch, seq, d_model), jnp.float32)
    v = jax.random.normal(k_v, (batch, seq, d_model), jnp.float32)

    # causal-style 0/1 mask, broadcast over heads (PyTorch masked_fill semantics)
    mask = jnp.tril(jnp.ones((seq, seq), jnp.float32))[None].repeat(batch, axis=0)

    out = jax.block_until_ready(mha(q, k, v, mask))
    ref = reference_forward(mha, q, k, v, mask)

    assert out.shape == (batch, seq, d_model)
    assert out.dtype == jnp.float32
    max_err = float(jnp.max(jnp.abs(out - ref)))
    # bf16 MXU operands vs f32 reference -> allow bf16-level tolerance
    assert max_err < 5e-2, f"mismatch vs reference: max abs err {max_err}"

    print("KERNEL_OK")
</pallas_src>

<mosaic_0001>
module attributes {stable_mosaic.version = 11 : i64} {
  func.func @_dense_kernel(%arg0: i32, %arg1: i32, %arg2: memref<16x32xf32, #tpu.memory_space<vmem>>, %arg3: memref<32x32xf32, #tpu.memory_space<vmem>>, %arg4: memref<1x32xf32, #tpu.memory_space<vmem>>, %arg5: memref<16x32xbf16, #tpu.memory_space<vmem>>) attributes {dimension_semantics = [#tpu.dimension_semantics<parallel>, #tpu.dimension_semantics<parallel>], iteration_bounds = array<i64: 1, 1>, scalar_prefetch = 0 : i64, scratch_operands = 0 : i64, tpu.core_type = #tpu.core_type<tc>, window_params = [{transform_indices = @transform_0, window_bounds = array<i64: 16, 32>}, {transform_indices = @transform_1, window_bounds = array<i64: 32, 32>}, {transform_indices = @transform_2, window_bounds = array<i64: 1, 32>}, {transform_indices = @transform_3, window_bounds = array<i64: 16, 32>}]} {
    %c0 = arith.constant 0 : index
    %c0_0 = arith.constant 0 : index
    %0 = vector.load %arg2[%c0, %c0_0] : memref<16x32xf32, #tpu.memory_space<vmem>>, vector<16x32xf32>
    %1 = arith.truncf %0 : vector<16x32xf32> to vector<16x32xbf16>
    %c0_1 = arith.constant 0 : index
    %c0_2 = arith.constant 0 : index
    %2 = vector.load %arg3[%c0_1, %c0_2] : memref<32x32xf32, #tpu.memory_space<vmem>>, vector<32x32xf32>
    %3 = arith.truncf %2 : vector<32x32xf32> to vector<32x32xbf16>
    %cst = arith.constant dense<0.000000e+00> : vector<16x32xf32>
    %4 = tpu.matmul %1, %3, %cst {dimension_numbers = #tpu.dot_dimension_numbers<[1], [0], [0], [1], [0, 0, 1, 1], [], []>} : vector<16x32xbf16>, vector<32x32xbf16>, vector<16x32xf32> -> vector<16x32xf32>
    %c0_3 = arith.constant 0 : index
    %c0_4 = arith.constant 0 : index
    %5 = vector.load %arg4[%c0_3, %c0_4] : memref<1x32xf32, #tpu.memory_space<vmem>>, vector<1x32xf32>
    %6 = vector.broadcast %5 : vector<1x32xf32> to vector<16x32xf32>
    %7 = arith.addf %4, %6 : vector<16x32xf32>
    %8 = arith.truncf %7 : vector<16x32xf32> to vector<16x32xbf16>
    %c0_5 = arith.constant 0 : index
    %c0_6 = arith.constant 0 : index
    %9 = vector.load %arg5[%c0_5, %c0_6] : memref<16x32xbf16, #tpu.memory_space<vmem>>, vector<16x32xbf16>
    tpu.vector_store %arg5[%c0_5, %c0_6], %8 {strides = array<i32>} : memref<16x32xbf16, #tpu.memory_space<vmem>>, vector<16x32xbf16>,
    return
  }
  func.func @transform_0(%arg0: i32, %arg1: i32) -> (i32, i32) {
    %c0_i32 = arith.constant 0 : i32
    %c0_i32_0 = arith.constant 0 : i32
    return %arg0, %c0_i32 : i32, i32
  }
  func.func @transform_1(%arg0: i32, %arg1: i32) -> (i32, i32) {
    %c0_i32 = arith.constant 0 : i32
    %c0_i32_0 = arith.constant 0 : i32
    return %c0_i32, %arg1 : i32, i32
  }
  func.func @transform_2(%arg0: i32, %arg1: i32) -> (i32, i32) {
    %c0_i32 = arith.constant 0 : i32
    %c0_i32_0 = arith.constant 0 : i32
    return %c0_i32, %arg1 : i32, i32
  }
  func.func @transform_3(%arg0: i32, %arg1: i32) -> (i32, i32) {
    %c0_i32 = arith.constant 0 : i32
    return %arg0, %arg1 : i32, i32
  }
}

</mosaic_0001>

<bundles_post_ra>
// kernel: tpu_custom_call.1
= control target key start
LH: loop header
LB: loop body
LE: loop exit
PB: predicated region body
PF: predicated region fallthrough
CT: control target
= control target key end

     0   :  { %8 = vsyncpa [#allocation3], 0  ;;  %s300_s0 = inlined_call_operand.hbm [shape: f32[16,32], index: 0, kind: input, shape index: {}]   ;;  %s301_s1 = inlined_call_operand.hbm [shape: f32[32,32], index: 1, kind: input, shape index: {}]   ;;  %s302_s2 = inlined_call_operand.vmem [shape: f32[1,32], index: 2, kind: input, shape index: {}]   ;;  %s303_s3 = inlined_call_operand.hbm [shape: bf16[16,32], index: 3, kind: output, shape index: {}]  }
   0x1   :  { %9 = vsyncpa [#allocation6], 0 }
   0x2   :  { %10 = vsyncpa [#allocation4], 0  ;;  %s232_s12 = smov [#allocation2]   ;;  %s160_s16 = scalar_lea.hbm %s300_s0, 256 }
   0x3   :  { %s16_s13 = sshll.u32 %s232_s12, 4  ;;  %p161_p0 = scmp.ne.s32.totalorder %s300_s0, %s160_s16  ;;  %s17_s13 = int_to_ptr.vmem [resolvable:$true] %s16_s13 }
   0x4   :  { %p164_p1 = scmp.lt.u32.totalorder %s160_s16, %s300_s0 }
   0x6   :  { %p166_p2 = pnand %p164_p1, %p161_p0 }
   0x8   :  { %169 = shalt.err (!%p166_p2)
}
   0x9   :  { %s170_s21 = scalar_lea.vmem %s17_s13, 256  ;;  %p175_p4 = scmp.lt.s32.totalorder %s17_s13, %s17_s13 }
   0xa   :  { %p171_p3 = scmp.ne.s32.totalorder %s17_s13, %s170_s21  ;;  %p176_p5 = scmp.lt.s32.totalorder %s170_s21, %s170_s21 }
   0xc   :  { %p177_p6 = por %p176_p5, %p175_p4 }
   0xe   :  { %p178_p7 = pnand %p177_p6, %p171_p3 }
  0x10   :  { %181 = shalt.err (!%p178_p7)
}
  0x11   :  { %s233_s22 = smov 128   ;;  %s234_s23 = smov 8  }
  0x12   :  { %22 = dma.hbm_to_vmem [thread:$0]  %s300_s0, 256, %s17_s13, [#allocation3], %s233_s22, %s233_s22, %s234_s23  }
  0x13   :  { %s235_s26 = smov [#allocation5]   ;;  %s182_s30 = scalar_lea.hbm %s301_s1, 512 }
  0x14   :  { %s28_s27 = sshll.u32 %s235_s26, 4  ;;  %p183_p8 = scmp.ne.s32.totalorder %s301_s1, %s182_s30  ;;  %s29_s27 = int_to_ptr.vmem [resolvable:$true] %s28_s27 }
  0x15   :  { %p186_p9 = scmp.lt.u32.totalorder %s182_s30, %s301_s1 }
  0x17   :  { %p188_p10 = pnand %p186_p9, %p183_p8 }
  0x19   :  { %191 = shalt.err (!%p188_p10)
}
  0x1a   :  { %s192_s8 = scalar_lea.vmem %s29_s27, 512  ;;  %p197_p12 = scmp.lt.s32.totalorder %s29_s27, %s29_s27 }
  0x1b   :  { %p193_p11 = scmp.ne.s32.totalorder %s29_s27, %s192_s8  ;;  %p198_p13 = scmp.lt.s32.totalorder %s192_s8, %s192_s8 }
  0x1d   :  { %p199_p0 = por %p198_p13, %p197_p12 }
  0x1f   :  { %p200_p1 = pnand %p199_p0, %p193_p11 }
  0x21   :  { %203 = shalt.err (!%p200_p1)
}
  0x22   :  { %34 = dma.hbm_to_vmem [thread:$0]  %s301_s1, 512, %s29_s27, [#allocation6], %s233_s22, %s233_s22, %s234_s23  }
  0x23   :  { %226 = dma.done.wait [#allocation3], 256  }
  0x24   :  { %227 = vsyncadd [#allocation3], 4294967040 }
  0x25   :  { %228 = dma.done.wait [#allocation6], 512  }
  0x26   :  { %229 = vsyncadd [#allocation6], 4294966784  ;;  %v236_v0 = vmov 0.0   ;;  %vm237_vm0 = vmmov 0   ;;  %v47_v1 = vld [vmem:[#allocation5] sm:$0xff]  ;;  %v48_v2 = vld [vmem:[#allocation5 + $0x8] sm:$0xff] }
  0x27   :  { %143 = vmatprep.subr.bf16.mxu0 %v236_v0  ;;  %147 = vmatprep.mubr.msk.bf16.mxu0 %vm237_vm0, %v236_v0  ;;  %v49_v3 = vld [vmem:[#allocation5 + $0x10] sm:$0xff]  ;;  %v51_v4 = vpack.c.bf16 %v48_v2, %v47_v1  ;;  %v50_v5 = vld [vmem:[#allocation5 + $0x18] sm:$0xff]  ;;  %vm60_vm1 = vcmask 261120   ;;  %s238_s11 = smov [#allocation7]   ;;  %vm113_vm2 = vcmask 257024  }
  0x28   :  { %v52_v6 = vpack.c.bf16 %v50_v5, %v49_v3  ;;  %v44_v7 = vld [vmem:[#allocation2] sm:$0xff]  ;;  %v45_v8 = vld [vmem:[#allocation2 + $0x8] sm:$0xff]  ;;  %s121_s12 = sshll.u32 %s238_s11, 4  ;;  %s122_s12 = int_to_ptr.vmem [resolvable:$true] %s121_s12 }
  0x29   :  { %144 = vmatpush3.bf16.msra.mxu0 %v51_v4  ;;  %v46_v9 = vpack.c.bf16 %v45_v8, %v44_v7  ;;  %v134_v10 = vld [vmem:[%s302_s2] ss:$0 sm:$0xff]  ;;  %s204_s13 = scalar_lea.vmem %s122_s12, 128  ;;  %p209_p3 = scmp.lt.s32.totalorder %s122_s12, %s122_s12 }
  0x2a   :  { %145 = vmatprep.subr.bf16.mxu0 %v236_v0  ;;  %p205_p2 = scmp.ne.s32.totalorder %s122_s12, %s204_s13  ;;  %p210_p4 = scmp.lt.s32.totalorder %s204_s13, %s204_s13 }
  0x2c   :  { %p211_p5 = por %p210_p4, %p209_p3 }
  0x2d   :  { %146 = vmatpush3.bf16.msra.mxu0 %v52_v6 }
  0x2e   :  { %p212_p6 = pnand %p211_p5, %p205_p2 }
  0x30   :  { %148 = vmatmul.mubr.msk.bf16.vlgmr.msra.gmra.mrb[0].mxu0 %vm60_vm1, %v46_v9 }
 0x103   :  { %v98_v11 = vpop.f32.mrb[0].mxu0 }
 0x104   :  { %v99_v12 = vadd.f32 %v134_v10, %v98_v11  ;;  %v149_v13 = vpop.f32.mrb[1].mxu0 }
 0x105   :  { %v101_v14 = vpop.f32.mrb[2].mxu0 }
 0x106   :  { %v138_v15 = vpack.c.bf16 %v99_v12, %v99_v12  ;;  %v102_v16 = vadd.f32 %v134_v10, %v101_v14  ;;  %v150_v17 = vpop.f32.mrb[3].mxu0 }
 0x108   :  { %114 = vst.msk [vmem:[#allocation7] sm:$0xf] %vm113_vm2, %v138_v15  ;;  %v139_v18 = vpack.c.bf16 %v102_v16, %v102_v16 }
 0x10a   :  { %115 = vst.msk [vmem:[#allocation7 + $0x4] sm:$0xf] %vm113_vm2, %v139_v18 }
 0x10b   :  { %215 = shalt.err (!%p212_p6)
}
 0x10c   :  { %s216_s15 = scalar_lea.hbm %s303_s3, 128 }
 0x10d   :  { %p217_p7 = scmp.ne.s32.totalorder %s303_s3, %s216_s15  ;;  %p220_p8 = scmp.lt.u32.totalorder %s216_s15, %s303_s3 }
 0x10f   :  { %p222_p9 = pnand %p220_p8, %p217_p7 }
 0x111   :  { %225 = shalt.err (!%p222_p9)
}
 0x112   :  { %s239_s20 = smov 64   ;;  %s240_s21 = smov 4  }
 0x113   :  { %127 = dma.vmem_to_hbm [thread:$0]  %s122_s12, 128, %s303_s3, [#allocation4], %s239_s20, %s239_s20, %s240_s21  }
 0x114   :  { %230 = dma.done.wait [#allocation4], 128  }
 0x115   :  { %231 = vsyncadd [#allocation4], 4294967168 }
 0x116   :  { %131 = vsyncpa [#allocation3], 1 }
 0x117   :  { %132 = vsyncpa [#allocation6], 1 }
 0x118   :  { %133 = vsyncpa [#allocation4], 1 }

</bundles_post_ra>
